<compile_context>
chip_gen: v5e
topology: v5e:2x2
jax: 0.10.0
libtpu: 0.0.40
codegen_flags: <defaults>
</compile_context>

<pallas_src>
import functools

import jax
import jax.numpy as jnp
from jax.experimental import pallas as pl
from jax.experimental.pallas import tpu as pltpu


# ---------------------------------------------------------------------------
# helpers
# ---------------------------------------------------------------------------
def _round_up(x, m):
    return (x + m - 1) // m * m


def _sublane_pack(itemsize):
    # sublane packing factor: f32 -> 8, bf16 -> 16, int8/fp8 -> 32
    return max(8, 32 // max(int(itemsize), 1))


def _choose_tile_p(hw, c, in_itemsize, n_out_rows, n_temp_rows, max_tile=None):
    """Pick a big lane tile with realistic VMEM accounting.

    bytes/lane = 2 inputs x 2 pipeline buffers x sublane-padded C x input itemsize
               + n_out_rows outputs x 2 buffers x 8 padded sublanes x 4 (f32)
               + n_temp_rows Mosaic f32 temporaries x sublane-padded C x 4
    Budget ~6 MiB keeps the whole kernel well under v5e's 16 MiB scoped-VMEM default.
    """
    in_itemsize = int(in_itemsize)
    c_in_pad = _round_up(c, _sublane_pack(in_itemsize))
    c_f32_pad = _round_up(c, 8)
    bytes_per_lane = (
        2 * 2 * c_in_pad * in_itemsize
        + n_out_rows * 2 * 8 * 4
        + n_temp_rows * c_f32_pad * 4
    )
    budget = 6 * 1024 * 1024
    budget_lanes = max(128, (budget // bytes_per_lane) // 128 * 128)
    tile = int(min(_round_up(hw, 128), 32768, budget_lanes))
    if max_tile is not None:
        tile = min(tile, max(128, int(max_tile)))
    return tile


def _grid_layout(n, hw, tile):
    """Grid = (n_splits, n, tiles_per_split) with a v7x-friendly pixel split for odd N."""
    n_tiles = pl.cdiv(hw, tile)
    n_splits = 2 if (n % 2 == 1 and n_tiles >= 2) else 1
    tiles_per_split = pl.cdiv(n_tiles, n_splits)
    needs_mask = (hw % tile != 0) or (n_tiles % n_splits != 0)

    if n_splits == 1:
        in_map = lambda s, b, j: (b, 0, j)
    else:
        # clamp spurious tile indices (fully masked in-kernel) so block indices stay in range
        in_map = lambda s, b, j: (b, 0, jnp.minimum(s * tiles_per_split + j, n_tiles - 1))
    out_map = lambda s, b, j: (s * n + b, 0, 0)
    return n_tiles, n_splits, tiles_per_split, needs_mask, in_map, out_map


_COMPILER_PARAMS = pltpu.CompilerParams(
    dimension_semantics=("parallel", "parallel", "arbitrary"),
    vmem_limit_bytes=32 * 1024 * 1024,
)


# ---------------------------------------------------------------------------
# Kernel 1: pseudo-label (confidence-masked) cross-entropy partial sums
# ---------------------------------------------------------------------------
def _fixmatch_ce_kernel(inv_thresh, hw, tile, tiles_per_split, needs_mask,
                        weak_ref, strong_ref, ce_ref, cnt_ref):
    # weak_ref / strong_ref: (1, C, T) logit tiles.
    # ce_ref / cnt_ref: (1, 1, T) resident output blocks (accumulated in place).
    j = pl.program_id(2)

    @pl.when(j == 0)
    def _init():
        ce_ref[...] = jnp.zeros_like(ce_ref)
        cnt_ref[...] = jnp.zeros_like(cnt_ref)

    w = weak_ref[0].astype(jnp.float32)     # (C, T) weak-branch logits (pseudo-label source)
    s = strong_ref[0].astype(jnp.float32)   # (C, T) reversed strong-branch logits
    _, t = w.shape

    # confidence: max softmax prob = 1/sum_exp_w >= tau   <=>   sum_exp_w <= 1/tau
    m_w = jnp.max(w, axis=0, keepdims=True)                        # (1, T)
    sum_exp_w = jnp.sum(jnp.exp(w - m_w), axis=0, keepdims=True)   # (1, T)
    keep = sum_exp_w <= inv_thresh                                  # (1, T)

    # CE(strong, argmax(weak)) = logsumexp(strong) - strong[pseudo_label]
    # strong[pseudo_label] taken as max over the tied-max positions of the weak logits
    # (differs from torch's first-index argmax only on exact ties — measure zero).
    s_at_label = jnp.max(jnp.where(w == m_w, s, -jnp.inf), axis=0, keepdims=True)
    m_s = jnp.max(s, axis=0, keepdims=True)
    lse_s = m_s + jnp.log(jnp.sum(jnp.exp(s - m_s), axis=0, keepdims=True))
    ce = lse_s - s_at_label                                         # (1, T)

    if needs_mask:
        base = (pl.program_id(0) * tiles_per_split + j) * tile
        col = jax.lax.broadcasted_iota(jnp.int32, (1, t), 1) + base
        keep = jnp.logical_and(keep, col < hw)

    ce_ref[...] += jnp.where(keep, ce, 0.0)[None]
    cnt_ref[...] += keep.astype(jnp.float32)[None]


@functools.partial(jax.jit, static_argnames=("confidence_thresh", "scale", "max_tile"))
def fixmatch_pseudo_label_loss(strong_logits, weak_logits, *, confidence_thresh, scale,
                               max_tile=None):
    n, c, h, w = weak_logits.shape
    hw = h * w
    weak3 = weak_logits.reshape(n, c, hw)      # free reshapes (no extra HBM pass)
    strong3 = strong_logits.reshape(n, c, hw)

    tile = _choose_tile_p(hw, c, weak_logits.dtype.itemsize,
                          n_out_rows=2, n_temp_rows=8, max_tile=max_tile)
    n_tiles, n_splits, tiles_per_split, needs_mask, in_map, out_map = _grid_layout(n, hw, tile)
    n_groups = n_splits * n

    kernel = functools.partial(_fixmatch_ce_kernel, 1.0 / float(confidence_thresh),
                               hw, tile, tiles_per_split, needs_mask)

    ce_parts, cnt_parts = pl.pallas_call(
        kernel,
        out_shape=(jax.ShapeDtypeStruct((n_groups, 1, tile), jnp.float32),
                   jax.ShapeDtypeStruct((n_groups, 1, tile), jnp.float32)),
        grid_spec=pltpu.PrefetchScalarGridSpec(
            num_scalar_prefetch=0,
            grid=(n_splits, n, tiles_per_split),
            in_specs=[pl.BlockSpec((1, c, tile), in_map),
                      pl.BlockSpec((1, c, tile), in_map)],
            out_specs=(pl.BlockSpec((1, 1, tile), out_map),
                       pl.BlockSpec((1, 1, tile), out_map)),
        ),
        compiler_params=_COMPILER_PARAMS,
    )(weak3, strong3)

    # If every pixel is below the confidence threshold this is 0/0 = NaN, matching
    # torch.nn.CrossEntropyLoss(reduction='mean') when all targets are ignore_index.
    return scale * (jnp.sum(ce_parts) / jnp.sum(cnt_parts))


# ---------------------------------------------------------------------------
# Kernel 2: transformation-consistency MSE partial sums (enable_pseudo_label=False)
# ---------------------------------------------------------------------------
def _fixmatch_mse_kernel(hw, tile, tiles_per_split, needs_mask,
                         strong_ref, weak_ref, out_ref):
    j = pl.program_id(2)

    @pl.when(j == 0)
    def _init():
        out_ref[...] = jnp.zeros_like(out_ref)

    a = strong_ref[0].astype(jnp.float32)   # (C, T)
    b = weak_ref[0].astype(jnp.float32)     # (C, T)
    t = a.shape[1]
    d = a - b
    sq = d * d

    if needs_mask:
        base = (pl.program_id(0) * tiles_per_split + j) * tile
        col = jax.lax.broadcasted_iota(jnp.int32, (1, t), 1) + base
        sq = jnp.where(col < hw, sq, 0.0)

    # reduce over C every step: cheap XLU cross-sublane sum, tiny (1, T) accumulator RMW
    out_ref[...] += jnp.sum(sq, axis=0, keepdims=True)[None]


@functools.partial(jax.jit, static_argnames=("scale", "max_tile"))
def fixmatch_mse_loss(strong_out, weak_out, *, scale, max_tile=None):
    n, c, h, w = weak_out.shape
    hw = h * w
    a3 = strong_out.reshape(n, c, hw)
    b3 = weak_out.reshape(n, c, hw)

    tile = _choose_tile_p(hw, c, weak_out.dtype.itemsize,
                          n_out_rows=1, n_temp_rows=4, max_tile=max_tile)
    n_tiles, n_splits, tiles_per_split, needs_mask, in_map, out_map = _grid_layout(n, hw, tile)
    n_groups = n_splits * n

    kernel = functools.partial(_fixmatch_mse_kernel, hw, tile, tiles_per_split, needs_mask)

    parts = pl.pallas_call(
        kernel,
        out_shape=jax.ShapeDtypeStruct((n_groups, 1, tile), jnp.float32),
        grid_spec=pltpu.PrefetchScalarGridSpec(
            num_scalar_prefetch=0,
            grid=(n_splits, n, tiles_per_split),
            in_specs=[pl.BlockSpec((1, c, tile), in_map),
                      pl.BlockSpec((1, c, tile), in_map)],
            out_specs=pl.BlockSpec((1, 1, tile), out_map),
        ),
        compiler_params=_COMPILER_PARAMS,
    )(a3, b3)

    inv_n_scaled = float(scale) / float(n * c * h * w)   # exact static division
    return jnp.sum(parts) * inv_n_scaled


# ---------------------------------------------------------------------------
# Module analogue
# ---------------------------------------------------------------------------
class FixMatchSegLossPallas:
    """JAX/Pallas analogue of FixMatchSegLoss (ce_weight=None path)."""

    def __init__(self, model, scale=1.0, enable_pseudo_label=True, confidence_thresh=0.9):
        # TODO(synk): ce_weight (per-class CE weights) not implemented; only the default
        #             ce_weight=None path of the PyTorch module is translated.
        self.model = model
        self.scale = float(scale)
        self.enable_pseudo_label = bool(enable_pseudo_label)
        self.confidence_thresh = float(confidence_thresh)

    @staticmethod
    def get_random_augmenters(ndim, key):
        # Random 90-degree rotation + random spatial flips (host-side choices, like .item()
        # in the PyTorch code); the rot90/flip themselves are pure layout ops done in JAX.
        # Note: odd rotation counts assume H == W (same as the torch module).
        k_rot, k_flip = jax.random.split(key)
        k90 = int(jax.random.randint(k_rot, (), 0, 4))
        flip_bits = jax.random.randint(k_flip, (ndim - 2,), 0, 2).tolist()
        flip_dims = tuple(i + 2 for i, b in enumerate(flip_bits) if b)

        def augment(x):
            x = jnp.rot90(x, k90, axes=(-1, -2))
            if flip_dims:
                x = jnp.flip(x, axis=flip_dims)
            return x

        def reverse_augment(x):
            if flip_dims:
                x = jnp.flip(x, axis=flip_dims)
            x = jnp.rot90(x, -k90, axes=(-1, -2))
            return x

        return augment, reverse_augment

    def __call__(self, inp, key):
        augment, reverse_augment = self.get_random_augmenters(inp.ndim, key)
        aug = augment(inp)
        out = self.model(inp)                       # weak branch
        aug_out = self.model(aug)                   # strong (augmented) branch
        aug_out_reversed = reverse_augment(aug_out)
        if self.enable_pseudo_label:
            return fixmatch_pseudo_label_loss(
                aug_out_reversed, out,
                confidence_thresh=self.confidence_thresh, scale=self.scale)
        return fixmatch_mse_loss(aug_out_reversed, out, scale=self.scale)


def make_pointwise_model(key, c_in, c_out, h, w):
    """Deterministic stand-in for the user-supplied `model` (1x1 conv + positional bias)."""
    k1, k2 = jax.random.split(key)
    wmat = jax.random.normal(k1, (c_out, c_in), jnp.float32)
    pos_bias = 0.1 * jax.random.normal(k2, (1, 1, h, w), jnp.float32)

    def model(x):
        return jnp.einsum("oc,nchw->nohw", wmat, x) + pos_bias

    return model


# ---------------------------------------------------------------------------
# plain-JAX references for the self-checks
# ---------------------------------------------------------------------------
def _ref_pseudo_label_loss(strong, weak, thresh, scale):
    probs = jax.nn.softmax(weak, axis=1)
    omax = jnp.max(probs, axis=1)
    label = jnp.argmax(weak, axis=1)
    keep = omax >= thresh
    logp = jax.nn.log_softmax(strong, axis=1)
    ce = -jnp.take_along_axis(logp, label[:, None], axis=1)[:, 0]
    return scale * jnp.sum(jnp.where(keep, ce, 0.0)) / jnp.sum(keep), jnp.sum(keep)


def _ref_mse_loss(strong, weak, scale):
    return scale * jnp.mean((strong - weak) ** 2)


# ---------------------------------------------------------------------------
# demo / self-check
# ---------------------------------------------------------------------------
if __name__ == "__main__":
    key = jax.random.PRNGKey(0)
    k_in, k_model, k_aug, k_a, k_b, k_c, k_d = jax.random.split(key, 7)

    # ---- main module-level check: N=2, C=4, H=W=16 --------------------------------
    N, C, H, W = 2, 4, 16, 16
    inp = jax.random.normal(k_in, (N, C, H, W), jnp.float32)
    model = make_pointwise_model(k_model, C, C, H, W)
    THRESH, SCALE = 0.3, 1.0

    loss_fn = FixMatchSegLossPallas(model, scale=SCALE, enable_pseudo_label=True,
                                    confidence_thresh=THRESH)
    loss = loss_fn(inp, k_aug)
    jax.block_until_ready(loss)

    augment, reverse = FixMatchSegLossPallas.get_random_augmenters(inp.ndim, k_aug)
    out_weak = model(inp)
    out_strong = reverse(model(augment(inp)))
    ref_ce, kept = _ref_pseudo_label_loss(out_strong, out_weak, THRESH, SCALE)
    assert kept > 0
    assert jnp.allclose(loss, ref_ce, rtol=1e-4, atol=1e-5), (loss, ref_ce)

    loss_fn_mse = FixMatchSegLossPallas(model, scale=2.0, enable_pseudo_label=False)
    loss_mse = loss_fn_mse(inp, k_aug)
    jax.block_until_ready(loss_mse)
    ref_mse = _ref_mse_loss(out_strong, out_weak, 2.0)
    assert jnp.allclose(loss_mse, ref_mse, rtol=1e-4, atol=1e-5), (loss_mse, ref_mse)

    # ---- extra path checks: multi-tile + ragged tail + odd-N pixel split ----------
    # (max_tile=128 forces several lane tiles so the split / tail-mask paths run)
    w1 = jax.random.normal(k_a, (1, 3, 8, 50), jnp.float32)      # hw=400 -> 4 tiles, ragged
    s1 = jax.random.normal(k_b, (1, 3, 8, 50), jnp.float32)
    got = fixmatch_pseudo_label_loss(s1, w1, confidence_thresh=0.5, scale=1.5, max_tile=128)
    ref, kept1 = _ref_pseudo_label_loss(s1, w1, 0.5, 1.5)
    assert kept1 > 0
    assert jnp.allclose(got, ref, rtol=1e-4, atol=1e-5), (got, ref)

    # hw=384 -> 3 tiles: odd tile count exercises the clamped (fully-masked) split tile
    w2 = jax.random.normal(k_c, (1, 5, 8, 48), jnp.float32)
    s2 = jax.random.normal(k_d, (1, 5, 8, 48), jnp.float32)
    got2 = fixmatch_pseudo_label_loss(s2, w2, confidence_thresh=0.35, scale=1.0, max_tile=128)
    ref2, kept2 = _ref_pseudo_label_loss(s2, w2, 0.35, 1.0)
    assert kept2 > 0
    assert jnp.allclose(got2, ref2, rtol=1e-4, atol=1e-5), (got2, ref2)

    got3 = fixmatch_mse_loss(s2, w2, scale=3.0, max_tile=128)
    ref3 = _ref_mse_loss(s2, w2, 3.0)
    assert jnp.allclose(got3, ref3, rtol=1e-4, atol=1e-5), (got3, ref3)

    jax.block_until_ready((got, got2, got3))
    print("KERNEL_OK")
</pallas_src>

<mosaic_0001>
module attributes {stable_mosaic.version = 11 : i64} {
  func.func @_fixmatch_ce_kernel(%arg0: i32, %arg1: i32, %arg2: i32, %arg3: memref<1x4x256xf32, #tpu.memory_space<vmem>>, %arg4: memref<1x4x256xf32, #tpu.memory_space<vmem>>, %arg5: memref<1x1x256xf32, #tpu.memory_space<vmem>>, %arg6: memref<1x1x256xf32, #tpu.memory_space<vmem>>) attributes {dimension_semantics = [#tpu.dimension_semantics<parallel>, #tpu.dimension_semantics<parallel>, #tpu.dimension_semantics<arbitrary>], iteration_bounds = array<i64: 1, 2, 1>, scalar_prefetch = 0 : i64, scratch_operands = 0 : i64, tpu.core_type = #tpu.core_type<tc>, window_params = [{transform_indices = @transform_0, window_bounds = array<i64: 1, 4, 256>}, {transform_indices = @transform_1, window_bounds = array<i64: 1, 4, 256>}, {transform_indices = @transform_2, window_bounds = array<i64: 1, 1, 256>}, {transform_indices = @transform_3, window_bounds = array<i64: 1, 1, 256>}]} {
    %c0_i32 = arith.constant 0 : i32
    %0 = arith.cmpi eq, %arg2, %c0_i32 : i32
    %1 = arith.extui %0 : i1 to i32
    %c0_i32_0 = arith.constant 0 : i32
    %2 = arith.cmpi ne, %1, %c0_i32_0 : i32
    scf.if %2 {
      %cst_25 = arith.constant 0.000000e+00 : f32
      %44 = vector.broadcast %cst_25 : f32 to vector<1x1x256xf32>
      %c0_26 = arith.constant 0 : index
      %c0_27 = arith.constant 0 : index
      %c0_28 = arith.constant 0 : index
      %45 = vector.load %arg5[%c0_26, %c0_27, %c0_28] : memref<1x1x256xf32, #tpu.memory_space<vmem>>, vector<1x1x256xf32>
      tpu.vector_store %arg5[%c0_26, %c0_27, %c0_28], %44 {strides = array<i32>} : memref<1x1x256xf32, #tpu.memory_space<vmem>>, vector<1x1x256xf32>,
      %cst_29 = arith.constant 0.000000e+00 : f32
      %46 = vector.broadcast %cst_29 : f32 to vector<1x1x256xf32>
      %c0_30 = arith.constant 0 : index
      %c0_31 = arith.constant 0 : index
      %c0_32 = arith.constant 0 : index
      %47 = vector.load %arg6[%c0_30, %c0_31, %c0_32] : memref<1x1x256xf32, #tpu.memory_space<vmem>>, vector<1x1x256xf32>
      tpu.vector_store %arg6[%c0_30, %c0_31, %c0_32], %46 {strides = array<i32>} : memref<1x1x256xf32, #tpu.memory_space<vmem>>, vector<1x1x256xf32>,
    } else {
    }
    %c0 = arith.constant 0 : index
    %c0_1 = arith.constant 0 : index
    %c0_2 = arith.constant 0 : index
    %3 = vector.load %arg3[%c0, %c0_1, %c0_2] : memref<1x4x256xf32, #tpu.memory_space<vmem>>, vector<1x4x256xf32>
    %4 = vector.shape_cast %3 : vector<1x4x256xf32> to vector<4x256xf32>
    %c0_3 = arith.constant 0 : index
    %c0_4 = arith.constant 0 : index
    %c0_5 = arith.constant 0 : index
    %5 = vector.load %arg4[%c0_3, %c0_4, %c0_5] : memref<1x4x256xf32, #tpu.memory_space<vmem>>, vector<1x4x256xf32>
    %6 = vector.shape_cast %5 : vector<1x4x256xf32> to vector<4x256xf32>
    %cst = arith.constant dense<0xFF800000> : vector<256xf32>
    %7 = vector.multi_reduction <maximumf>, %4, %cst [0] : vector<4x256xf32> to vector<256xf32>
    %8 = vector.shape_cast %7 : vector<256xf32> to vector<1x256xf32>
    %9 = vector.broadcast %8 : vector<1x256xf32> to vector<4x256xf32>
    %10 = arith.subf %4, %9 : vector<4x256xf32>
    %11 = math.exp %10 : vector<4x256xf32>
    %cst_6 = arith.constant dense<0.000000e+00> : vector<256xf32>
    %12 = vector.multi_reduction <add>, %11, %cst_6 [0] : vector<4x256xf32> to vector<256xf32>
    %13 = vector.shape_cast %12 : vector<256xf32> to vector<1x256xf32>
    %cst_7 = arith.constant 3.33333325 : f32
    %14 = vector.broadcast %cst_7 : f32 to vector<1x256xf32>
    %15 = arith.cmpf ole, %13, %14 : vector<1x256xf32>
    %16 = vector.broadcast %8 : vector<1x256xf32> to vector<4x256xf32>
    %17 = arith.cmpf oeq, %4, %16 : vector<4x256xf32>
    %cst_8 = arith.constant 0xFF800000 : f32
    %18 = vector.broadcast %cst_8 : f32 to vector<4x256xf32>
    %19 = arith.select %17, %6, %18 : vector<4x256xi1>, vector<4x256xf32>
    %cst_9 = arith.constant dense<0xFF800000> : vector<256xf32>
    %20 = vector.multi_reduction <maximumf>, %19, %cst_9 [0] : vector<4x256xf32> to vector<256xf32>
    %21 = vector.shape_cast %20 : vector<256xf32> to vector<1x256xf32>
    %cst_10 = arith.constant dense<0xFF800000> : vector<256xf32>
    %22 = vector.multi_reduction <maximumf>, %6, %cst_10 [0] : vector<4x256xf32> to vector<256xf32>
    %23 = vector.shape_cast %22 : vector<256xf32> to vector<1x256xf32>
    %24 = vector.broadcast %23 : vector<1x256xf32> to vector<4x256xf32>
    %25 = arith.subf %6, %24 : vector<4x256xf32>
    %26 = math.exp %25 : vector<4x256xf32>
    %cst_11 = arith.constant dense<0.000000e+00> : vector<256xf32>
    %27 = vector.multi_reduction <add>, %26, %cst_11 [0] : vector<4x256xf32> to vector<256xf32>
    %28 = vector.shape_cast %27 : vector<256xf32> to vector<1x256xf32>
    %29 = math.log %28 : vector<1x256xf32>
    %30 = arith.addf %23, %29 : vector<1x256xf32>
    %31 = arith.subf %30, %21 : vector<1x256xf32>
    %c0_12 = arith.constant 0 : index
    %c0_13 = arith.constant 0 : index
    %c0_14 = arith.constant 0 : index
    %32 = vector.load %arg5[%c0_12, %c0_13, %c0_14] : memref<1x1x256xf32, #tpu.memory_space<vmem>>, vector<1x1x256xf32>
    %cst_15 = arith.constant 0.000000e+00 : f32
    %33 = vector.broadcast %cst_15 : f32 to vector<1x256xf32>
    %34 = arith.select %15, %31, %33 : vector<1x256xi1>, vector<1x256xf32>
    %35 = vector.shape_cast %34 : vector<1x256xf32> to vector<1x1x256xf32>
    %36 = arith.addf %32, %35 : vector<1x1x256xf32>
    %c0_16 = arith.constant 0 : index
    %c0_17 = arith.constant 0 : index
    %c0_18 = arith.constant 0 : index
    %37 = vector.load %arg5[%c0_16, %c0_17, %c0_18] : memref<1x1x256xf32, #tpu.memory_space<vmem>>, vector<1x1x256xf32>
    tpu.vector_store %arg5[%c0_16, %c0_17, %c0_18], %36 {strides = array<i32>} : memref<1x1x256xf32, #tpu.memory_space<vmem>>, vector<1x1x256xf32>,
    %c0_19 = arith.constant 0 : index
    %c0_20 = arith.constant 0 : index
    %c0_21 = arith.constant 0 : index
    %38 = vector.load %arg6[%c0_19, %c0_20, %c0_21] : memref<1x1x256xf32, #tpu.memory_space<vmem>>, vector<1x1x256xf32>
    %39 = arith.extui %15 : vector<1x256xi1> to vector<1x256xi32>
    %40 = arith.sitofp %39 : vector<1x256xi32> to vector<1x256xf32>
    %41 = vector.shape_cast %40 : vector<1x256xf32> to vector<1x1x256xf32>
    %42 = arith.addf %38, %41 : vector<1x1x256xf32>
    %c0_22 = arith.constant 0 : index
    %c0_23 = arith.constant 0 : index
    %c0_24 = arith.constant 0 : index
    %43 = vector.load %arg6[%c0_22, %c0_23, %c0_24] : memref<1x1x256xf32, #tpu.memory_space<vmem>>, vector<1x1x256xf32>
    tpu.vector_store %arg6[%c0_22, %c0_23, %c0_24], %42 {strides = array<i32>} : memref<1x1x256xf32, #tpu.memory_space<vmem>>, vector<1x1x256xf32>,
    return
  }
  func.func @transform_0(%arg0: i32, %arg1: i32, %arg2: i32) -> (i32, i32, i32) {
    %c0_i32 = arith.constant 0 : i32
    %c0_i32_0 = arith.constant 0 : i32
    return %arg1, %c0_i32, %arg2 : i32, i32, i32
  }
  func.func @transform_1(%arg0: i32, %arg1: i32, %arg2: i32) -> (i32, i32, i32) {
    %c0_i32 = arith.constant 0 : i32
    %c0_i32_0 = arith.constant 0 : i32
    return %arg1, %c0_i32, %arg2 : i32, i32, i32
  }
  func.func @transform_2(%arg0: i32, %arg1: i32, %arg2: i32) -> (i32, i32, i32) {
    %c2_i32 = arith.constant 2 : i32
    %0 = arith.muli %arg0, %c2_i32 : i32
    %1 = arith.addi %0, %arg1 : i32
    %c0_i32 = arith.constant 0 : i32
    %c0_i32_0 = arith.constant 0 : i32
    %c0_i32_1 = arith.constant 0 : i32
    return %1, %c0_i32, %c0_i32_0 : i32, i32, i32
  }
  func.func @transform_3(%arg0: i32, %arg1: i32, %arg2: i32) -> (i32, i32, i32) {
    %c2_i32 = arith.constant 2 : i32
    %0 = arith.muli %arg0, %c2_i32 : i32
    %1 = arith.addi %0, %arg1 : i32
    %c0_i32 = arith.constant 0 : i32
    %c0_i32_0 = arith.constant 0 : i32
    %c0_i32_1 = arith.constant 0 : i32
    return %1, %c0_i32, %c0_i32_0 : i32, i32, i32
  }
}

</mosaic_0001>

<bundles_post_ra>
// kernel: fixmatch_pseudo_label_loss.1
= control target key start
LH: loop header
LB: loop body
LE: loop exit
PB: predicated region body
PF: predicated region fallthrough
CT: control target
= control target key end

     0   :  { %s666_s12 = smov 0   ;;  %s668_s13 = smov 0   ;;  %s763_s0 = inlined_call_operand.vmem [shape: f32[2,4,256], index: 0, kind: input, shape index: {}]   ;;  %s764_s1 = inlined_call_operand.vmem [shape: f32[2,4,256], index: 1, kind: input, shape index: {}]   ;;  %s765_s2 = inlined_call_operand.vmem [shape: f32[2,1,256], index: 2, kind: output, shape index: {0}]   ;;  %s766_s3 = inlined_call_operand.vmem [shape: f32[2,1,256], index: 3, kind: output, shape index: {1}]  }
   0x1   :  { %s670_s14 = smov 0  }
   0x2 LB: > { %s29_s15 = sadd.s32 1, %s639_s13  ;;  %p575_p0 = scmp.ge.s32.totalorder %s643_s14, 1  ;;  %s643_s14 = sphi %s670_s14, %s14_s14   ;;  %s639_s13 = sphi %s668_s13, %s770_s13   ;;  %s635_s12 = sphi %s666_s12, %s769_s12  }
   0x3   : > { %p31_p1 = scmp.ge.s32.totalorder %s29_s15, 2  ;;  %p191_p2 = scmp.lt.s32.totalorder %s643_s14, 3 }
   0x5   : > { %s772_s15 = smov (%p31_p1, %s29_s15), 0  ;;  %p192_p3 = pnand %p575_p0, %p191_p2 }
   0x6   : > { %p236_p4 = scmp.lt.s32.totalorder (!%p192_p3), %s635_s12, 1 }
   0x7   : > { %195 = sbr.rel (%p192_p3) target bundleno = 145 (0x91), region = 28 }
   0xc   : > { %s774_s12 = smov (!%p236_p4, %s635_s12), 1  ;;  %vm289_vm0 = vcmask 1043456   ;;  %v275_v15 = vlaneseq  ;;  %v645_v20 = vmov 0.0   ;;  %vm418_vm5 = vcmask 1040384  }
   0xd   : > { %s586_s16 = sshll.u32 %s774_s12, 3  ;;  %s580_s20 = sshll.u32 %s774_s12, 1 }
   0xe   : > { %s243_s19 = scalar_lea.vmem %s763_s0, %s586_s16  ;;  %s698_s23 = scalar_lea.vmem %s766_s3, %s580_s20  ;;  %vm705_vm1 = vcmp.lt.s32.totalorder %v275_v15, 256 }
   0xf   : > { %v281_v0 = vld [vmem:[%s243_s19] sm:$0xff]  ;;  %s703_s26 = scalar_lea.vmem %s765_s2, %s580_s20  ;;  %280 = vst.msk [vmem:[%s698_s23] sm:$0x3] %vm705_vm1, %v645_v20  ;;  %s253_s29 = scalar_lea.vmem %s764_s1, %s586_s16 }
  0x10   : > { %284 = vst [vmem:[#allocation1] ss:$2 sm:$0xff] %v281_v0  ;;  %v282_v25 = vld [vmem:[%s253_s29] sm:$0xff] }
  0x11   : > { %279 = vst.msk [vmem:[%s703_s26] sm:$0x3] %vm705_vm1, %v645_v20 }
  0x16   : > { %v427_v46 = vld [vmem:[%s698_s23] sm:$0x3] }
  0x17   : > { %v285_v1 = vld.sshfl [vmem:[#allocation1] sm:$0xff pattern:$0x75316420]  ;;  %v286_v2 = vld.sshfl [vmem:[#allocation1 + $0x8] sm:$0xff pattern:$0x75316420] }
  0x18   : > { %v290_v3 = vsel %vm289_vm0, %v285_v1, -inf  ;;  %v297_v4 = vsel %vm289_vm0, %v286_v2, -inf }
  0x19   : > { %v291_v5 = vrot.slane %v290_v3, 4  ;;  %v298_v6 = vrot.slane %v297_v4, 4 }
  0x1b   : > { %v292_v7 = vmax.f32 %v290_v3, %v291_v5  ;;  %v299_v8 = vmax.f32 %v297_v4, %v298_v6 }
  0x1d   : > { %v293_v9 = vrot.slane %v292_v7, 2  ;;  %v300_v10 = vrot.slane %v299_v8, 2 }
  0x1f   : > { %v294_v11 = vmax.f32 %v292_v7, %v293_v9  ;;  %v301_v12 = vmax.f32 %v299_v8, %v300_v10 }
  0x21   : > { %v295_v13 = vrot.slane %v294_v11, 1  ;;  %v302_v14 = vrot.slane %v301_v12, 1 }
  0x23   : > { %v303_v16 = vmax.f32 %v301_v12, %v302_v14  ;;  %v296_v18 = vmax.f32 %v294_v11, %v295_v13 }
  0x25   : > { %v306_v19 = vrot.slane %v303_v16, 4 }
  0x27   : > { %v307_v21 = vsel %vm289_vm0, %v296_v18, %v306_v19 }
  0x28   : > { %v309_v22 = vsub.f32 %v281_v0, %v307_v21  ;;  %vm334_vm2 = vcmp.eq.f32.partialorder %v281_v0, %v307_v21 }
  0x29   : > { %v335_v26 = vsel %vm334_vm2, %v282_v25, -inf }
  0x2a   : > { %v310_v23 = vmul.f32 1.442695, %v309_v22 }
  0x2c   : > { %613 = vpow2.f32 %v310_v23 }
  0x32   : > { %v614_v24 = vpop.eup %613 }
  0x33   : > { %313 = vst [vmem:[#allocation1] ss:$2 sm:$0xff] %v614_v24 }
  0x3a   : > { %v314_v27 = vld.sshfl [vmem:[#allocation1] sm:$0xff pattern:$0x75316420]  ;;  %v315_v28 = vld.sshfl [vmem:[#allocation1 + $0x8] sm:$0xff pattern:$0x75316420] }
  0x3b   : > { %v318_v29 = vsel %vm289_vm0, %v314_v27, 0.0  ;;  %v325_v30 = vsel %vm289_vm0, %v315_v28, 0.0  ;;  %337 = vst [vmem:[#allocation1] ss:$2 sm:$0xff] %v335_v26 }
  0x3c   : > { %v319_v31 = vrot.slane %v318_v29, 4  ;;  %v326_v32 = vrot.slane %v325_v30, 4 }
  0x3e   : > { %v320_v33 = vadd.f32 %v319_v31, %v318_v29  ;;  %v327_v34 = vadd.f32 %v326_v32, %v325_v30 }
  0x40   : > { %v321_v35 = vrot.slane %v320_v33, 2  ;;  %v328_v36 = vrot.slane %v327_v34, 2 }
  0x42   : > { %v338_v37 = vld.sshfl [vmem:[#allocation1] sm:$0xff pattern:$0x75316420]  ;;  %v339_v38 = vld.sshfl [vmem:[#allocation1 + $0x8] sm:$0xff pattern:$0x75316420]  ;;  %v322_v39 = vadd.f32 %v321_v35, %v320_v33  ;;  %v329_v40 = vadd.f32 %v328_v36, %v327_v34 }
  0x43   : > { %357 = vst [vmem:[#allocation1] ss:$2 sm:$0xff] %v282_v25  ;;  %v349_v10 = vsel %vm289_vm0, %v339_v38, -inf  ;;  %v342_v11 = vsel %vm289_vm0, %v338_v37, -inf }
  0x44   : > { %v323_v41 = vrot.slane %v322_v39, 1  ;;  %v330_v42 = vrot.slane %v329_v40, 1  ;;  %v350_v16 = vrot.slane %v349_v10, 4  ;;  %v343_v18 = vrot.slane %v342_v11, 4 }
  0x46   : > { %v723_v43 = vadd.f32 %v323_v41, %v322_v39  ;;  %v725_v44 = vadd.f32 %v330_v42, %v329_v40  ;;  %v344_v23 = vmax.f32 %v342_v11, %v343_v18  ;;  %v351_v24 = vmax.f32 %v349_v10, %v350_v16 }
  0x48   : > { %vm332_vm3 = vcmp.le.f32.partialorder %v723_v43, 3.3333333  ;;  %vm333_vm4 = vcmp.le.f32.partialorder %v725_v44, 3.3333333  ;;  %v345_v29 = vrot.slane %v344_v23, 2  ;;  %v352_v30 = vrot.slane %v351_v24, 2 }
  0x49   : > { %v583_v45 = vsel %vm333_vm4, 1.0, %v645_v20  ;;  %v582_v49 = vsel %vm332_vm3, 1.0, %v645_v20 }
  0x4a   : > { %v434_v47 = vrot.slane %v583_v45, 7  ;;  %v358_v48 = vld.sshfl [vmem:[#allocation1] sm:$0xff pattern:$0x75316420]  ;;  %v346_v33 = vmax.f32 %v344_v23, %v345_v29  ;;  %v353_v34 = vmax.f32 %v351_v24, %v352_v30 }
  0x4b   : > { %v359_v50 = vld.sshfl [vmem:[#allocation1 + $0x8] sm:$0xff pattern:$0x75316420]  ;;  %v362_v51 = vsel %vm289_vm0, %v358_v48, -inf }
  0x4c   : > { %v435_v52 = vsel %vm418_vm5, %v582_v49, %v434_v47  ;;  %v363_v53 = vrot.slane %v362_v51, 4  ;;  %v369_v54 = vsel %vm289_vm0, %v359_v50, -inf  ;;  %v347_v36 = vrot.slane %v346_v33, 1  ;;  %v412_v50 = vld [vmem:[%s703_s26] sm:$0x3] }
  0x4d   : > { %v437_v55 = vadd.f32 %v435_v52, %v427_v46  ;;  %v370_v56 = vrot.slane %v369_v54, 4  ;;  %v354_v37 = vrot.slane %v353_v34, 1 }
  0x4e   : > { %v364_v57 = vmax.f32 %v362_v51, %v363_v53  ;;  %v348_v42 = vmax.f32 %v346_v33, %v347_v36 }
  0x4f   : > { %438 = vst.msk [vmem:[%s698_s23] sm:$0x3] %vm705_vm1, %v437_v55  ;;  %v371_v58 = vmax.f32 %v369_v54, %v370_v56  ;;  %v355_v45 = vmax.f32 %v353_v34, %v354_v37 }
  0x50   : > { %v365_v59 = vrot.slane %v364_v57, 2 }
  0x51   : > { %v372_v60 = vrot.slane %v371_v58, 2 }
  0x52   : > { %v366_v61 = vmax.f32 %v364_v57, %v365_v59 }
  0x53   : > { %v373_v62 = vmax.f32 %v371_v58, %v372_v60 }
  0x54   : > { %v367_v63 = vrot.slane %v366_v61, 1 }
  0x55   : > { %v374_v0 = vrot.slane %v373_v62, 1 }
  0x56   : > { %v368_v2 = vmax.f32 %v366_v61, %v367_v63 }
  0x57   : > { %v375_v1 = vmax.f32 %v373_v62, %v374_v0 }
  0x59   : > { %v378_v3 = vrot.slane %v375_v1, 4 }
  0x5b   : > { %v379_v4 = vsel %vm289_vm0, %v368_v2, %v378_v3 }
  0x5c   : > { %v381_v5 = vsub.f32 %v282_v25, %v379_v4 }
  0x5e   : > { %v382_v6 = vmul.f32 1.442695, %v381_v5 }
  0x60   : > { %615 = vpow2.f32 %v382_v6 }
  0x66   : > { %v616_v7 = vpop.eup %615 }
  0x67   : > { %385 = vst [vmem:[#allocation1] ss:$2 sm:$0xff] %v616_v7 }
  0x6e   : > { %v386_v8 = vld.sshfl [vmem:[#allocation1] sm:$0xff pattern:$0x75316420]  ;;  %v387_v9 = vld.sshfl [vmem:[#allocation1 + $0x8] sm:$0xff pattern:$0x75316420] }
  0x6f   : > { %v390_v12 = vsel %vm289_vm0, %v386_v8, 0.0  ;;  %v397_v13 = vsel %vm289_vm0, %v387_v9, 0.0 }
  0x70   : > { %v391_v14 = vrot.slane %v390_v12, 4  ;;  %v398_v15 = vrot.slane %v397_v13, 4 }
  0x72   : > { %v392_v19 = vadd.f32 %v391_v14, %v390_v12  ;;  %v399_v20 = vadd.f32 %v398_v15, %v397_v13 }
  0x74   : > { %v393_v21 = vrot.slane %v392_v19, 2  ;;  %v400_v22 = vrot.slane %v399_v20, 2 }
  0x76   : > { %v394_v25 = vadd.f32 %v393_v21, %v392_v19  ;;  %v401_v26 = vadd.f32 %v400_v22, %v399_v20 }
  0x78   : > { %v395_v27 = vrot.slane %v394_v25, 1  ;;  %v402_v28 = vrot.slane %v401_v26, 1 }
  0x7a   : > { %v396_v31 = vadd.f32 %v395_v27, %v394_v25  ;;  %v403_v32 = vadd.f32 %v402_v28, %v401_v26 }
  0x7c   : > { %617 = vlog2.f32 %v396_v31 }
  0x7d   : > { %619 = vlog2.f32 %v403_v32 }
  0x82   : > { %v618_v35 = vpop.eup %617 }
  0x83   : > { %v620_v38 = vpop.eup %619  ;;  %v405_v39 = vmul.f32 0.6931472, %v618_v35 }
  0x84   : > { %v407_v40 = vmul.f32 0.6931472, %v620_v38 }
  0x85   : > { %v408_v41 = vadd.f32 %v405_v39, %v368_v2 }
  0x86   : > { %v409_v46 = vadd.f32 %v407_v40, %v375_v1 }
  0x87   : > { %v410_v47 = vsub.f32 %v408_v41, %v348_v42 }
  0x88   : > { %v411_v48 = vsub.f32 %v409_v46, %v355_v45 }
  0x89   : > { %v413_v52 = vsel %vm332_vm3, %v410_v47, 0.0 }
  0x8a   : > { %v414_v49 = vsel %vm333_vm4, %v411_v48, 0.0 }
  0x8b   : > { %v417_v51 = vrot.slane %v414_v49, 7 }
  0x8d   : > { %v419_v53 = vsel %vm418_vm5, %v413_v52, %v417_v51 }
  0x8e   : > { %v421_v54 = vadd.f32 %v419_v53, %v412_v50 }
  0x90   : > { %426 = vst.msk [vmem:[%s703_s26] sm:$0x3] %vm705_vm1, %v421_v54 }
  0x91 PF: > { %s14_s14 = sadd.s32 1, %s643_s14   ;;  %s769_s12 = smov %s639_s13 }
  0x92   : > { %p11_p5 = scmp.ge.s32.totalorder %s14_s14, 4   ;;  %s770_s13 = smov %s772_s15 }
  0x94   :  { %13 = sbr.rel (!%p11_p5) target bundleno = 2 (0x2), region = 77 }

</bundles_post_ra>
